<compile_context>
chip_gen: v6e
topology: v6e:2x2x1
jax: 0.10.0
libtpu: 0.0.40
codegen_flags: <defaults>
</compile_context>

<pallas_src>
import jax
import jax.numpy as jnp
from jax.experimental import pallas as pl
from jax.experimental.pallas import tpu as pltpu


# --------------------------------------------------------------------------
# Kernels
# --------------------------------------------------------------------------
def _fused_linear_kernel(x_ref, w_ref, b_ref, out_ref):
    # x_ref: (TB, K)        -- K = D_in (CLS) or S*D_in (folded mean)
    # w_ref: (K, C_pad)     b_ref: (1, C_pad)
    # out_ref: (TB, C_pad)  lane-dense (C_pad multiple of 128)
    x = x_ref[...].astype(jnp.float32)          # cast after DMA (rr may be bf16)
    out_ref[...] = (
        jnp.dot(x, w_ref[...], preferred_element_type=jnp.float32)
        + b_ref[...]
    ).astype(out_ref.dtype)


def _mean_fused_linear_kernel(rr_ref, w_ref, b_ref, out_ref):
    # Fallback for huge S*D_in*C_pad where the stacked weight would not fit:
    # mean-pool over seq in-kernel, then one fused matmul.
    # rr_ref: (TB, S, D_in)  w_ref: (D_in, C_pad)  b_ref: (1, C_pad)
    pooled = jnp.mean(rr_ref[...].astype(jnp.float32), axis=1)   # (TB, D_in)
    out_ref[...] = (
        jnp.dot(pooled, w_ref[...], preferred_element_type=jnp.float32)
        + b_ref[...]
    ).astype(out_ref.dtype)


# --------------------------------------------------------------------------
# Tiling helpers
# --------------------------------------------------------------------------
def _vmem_budget_bytes():
    """Generation-aware VMEM budget: ~3/4 of physical VMEM, capped at 100MiB.

    v5e/v6e: 128 MiB physical -> ~96 MiB budget.
    v7x:      64 MiB physical -> ~48 MiB budget.
    Falls back to the v7x-safe value if the query is unavailable.
    """
    try:
        cap = int(pltpu.get_tpu_info().vmem_capacity_bytes)
    except Exception:
        cap = 64 * 1024 * 1024
    return min((cap * 3) // 4, 100 * 1024 * 1024)


def _pick_batch_tile(B, bytes_per_row, resident_bytes, budget):
    """Largest batch tile (multiple of 8, <= 512) fitting the VMEM budget."""
    if B <= 8:
        return B                        # tiny batch: single full-batch tile
    usable = max(budget - resident_bytes, 8 * bytes_per_row)
    tb = min(usable // bytes_per_row, 512, B)
    if B >= 16:
        # Keep at least two grid steps so ("parallel",) can shard the batch
        # across both TensorCores on v7x (no-op on v5e/v6e).
        half = (B + 1) // 2
        tb = min(tb, ((half + 7) // 8) * 8)
    return max((tb // 8) * 8, 8)


# --------------------------------------------------------------------------
# Forward wrapper
# --------------------------------------------------------------------------
def unimodal_rr_forward(rr, w_enc, b_enc, w_cls, b_cls, *,
                        use_cls_token='mean'):
    """Fused UnimodalRR forward. Returns a dict like the torch module."""
    B, S, D_in = rr.shape
    D_feat = w_enc.shape[1]
    C = w_cls.shape[1]
    f32 = jnp.float32

    # torch code compares against the string 'cls'; accept bool too.
    use_cls = (use_cls_token is True) or (use_cls_token == 'cls')

    # ---- lane-dense padded classifier + linear/linear fusion (wrapper) ----
    C_pad = ((C + 127) // 128) * 128
    w_cls_p = jnp.zeros((D_feat, C_pad), f32).at[:, :C].set(w_cls.astype(f32))
    b_cls_p = jnp.zeros((1, C_pad), f32).at[:, :C].set(
        b_cls.reshape(1, C).astype(f32))

    hi = jax.lax.Precision.HIGHEST
    w_fused = jnp.dot(w_enc.astype(f32), w_cls_p, precision=hi)     # (D_in, C_pad)
    b_fused = (jnp.dot(b_enc.reshape(1, D_feat).astype(f32), w_cls_p,
                       precision=hi) + b_cls_p)                      # (1, C_pad)

    budget = _vmem_budget_bytes()
    rr_item = rr.dtype.itemsize
    out_row_bytes = 2 * C_pad * 4            # double-buffered output rows
    fold_mean_bytes = S * D_in * C_pad * 4   # stacked weight for folded mean

    if use_cls:
        # CLS path: kernel sees only token 0 (never DMAs the rest of rr).
        x_kern = rr[:, 0, :]                                   # (B, D_in)
        K = D_in
        w_kern, b_kern = w_fused, b_fused
        kernel, three_d = _fused_linear_kernel, False
        flops = 2 * B * K * C_pad
        in_bytes = B * K * rr_item
        row_bytes = 2 * K * rr_item + out_row_bytes
    elif fold_mean_bytes <= 8 * 1024 * 1024:
        # Mean path, folded into the matmul: rr -> (B, S*D_in) (free reshape),
        # weight = vertical stack of w_fused / S.
        x_kern = rr.reshape(B, S * D_in)
        K = S * D_in
        w_kern = jnp.tile(w_fused * (1.0 / S), (S, 1))          # (S*D_in, C_pad)
        b_kern = b_fused
        kernel, three_d = _fused_linear_kernel, False
        flops = 2 * B * K * C_pad
        in_bytes = B * K * rr_item
        row_bytes = 2 * K * rr_item + out_row_bytes
    else:
        # Mean path, fallback: pool in-kernel (stacked weight too large).
        x_kern = rr
        K = D_in
        w_kern, b_kern = w_fused, b_fused
        kernel, three_d = _mean_fused_linear_kernel, True
        flops = B * S * D_in + 2 * B * D_in * C_pad
        in_bytes = B * S * D_in * rr_item
        row_bytes = 2 * S * D_in * rr_item + out_row_bytes

    # Resident (constant-index) weights are double-buffered by Pallas.
    resident_bytes = 2 * (w_kern.size + b_kern.size) * 4
    TB = _pick_batch_tile(B, row_bytes, resident_bytes, budget)
    grid = (pl.cdiv(B, TB),)

    if three_d:
        x_spec = pl.BlockSpec((TB, S, D_in), lambda i: (i, 0, 0))
    else:
        x_spec = pl.BlockSpec((TB, K), lambda i: (i, 0))
    w_spec = pl.BlockSpec(w_kern.shape, lambda i: (0, 0))        # resident
    b_spec = pl.BlockSpec((1, C_pad), lambda i: (0, 0))          # resident

    cost = pl.CostEstimate(
        flops=int(flops),
        transcendentals=0,
        bytes_accessed=int(in_bytes + (w_kern.size + b_kern.size) * 4
                           + B * C_pad * 4))

    logits_pad = pl.pallas_call(
        kernel,
        out_shape=jax.ShapeDtypeStruct((B, C_pad), jnp.float32),
        grid=grid,
        in_specs=[x_spec, w_spec, b_spec],
        out_specs=pl.BlockSpec((TB, C_pad), lambda i: (i, 0)),
        compiler_params=pltpu.CompilerParams(
            dimension_semantics=("parallel",),   # v7x: shard batch over 2 TCs
            vmem_limit_bytes=int(budget),        # generation-aware scoped VMEM
        ),
        cost_estimate=cost,
    )(x_kern, w_kern, b_kern)

    logits = logits_pad[:, :C]
    return {'unimodal_rr': logits, 'unified': logits}


# --------------------------------------------------------------------------
# Self-test
# --------------------------------------------------------------------------
if __name__ == "__main__":
    # Small shapes consistent with the module's forward:
    #   rr: (batch=2, seq=8, d_in=32); feats_dim_rr=32; num_classes=4
    B, S, D_in, D_feat, C = 2, 8, 32, 32, 4

    key = jax.random.PRNGKey(0)
    k_rr, k_we, k_be, k_wc, k_bc = jax.random.split(key, 5)

    rr = jax.random.normal(k_rr, (B, S, D_in), dtype=jnp.float32)

    # Deterministic parameter init (synthetic text encoder + Classifier).
    w_enc = jax.random.normal(k_we, (D_in, D_feat), dtype=jnp.float32) * 0.05
    b_enc = jax.random.normal(k_be, (D_feat,), dtype=jnp.float32) * 0.01
    w_cls = jax.random.normal(k_wc, (D_feat, C), dtype=jnp.float32) * 0.05
    b_cls = jax.random.normal(k_bc, (C,), dtype=jnp.float32) * 0.01

    # Reference in plain JAX (same math as the torch module: project every
    # token, then pool, then classify).
    feats_ref = jnp.einsum('bsd,de->bse', rr, w_enc) + b_enc

    # --- mean-pooling path ---
    out_mean = unimodal_rr_forward(rr, w_enc, b_enc, w_cls, b_cls,
                                   use_cls_token='mean')
    jax.block_until_ready(out_mean)
    ref_mean = feats_ref.mean(axis=1) @ w_cls + b_cls
    assert jnp.allclose(out_mean['unimodal_rr'], ref_mean,
                        atol=1e-4, rtol=1e-4)
    assert jnp.array_equal(out_mean['unimodal_rr'], out_mean['unified'])

    # --- CLS-token path ---
    out_cls = unimodal_rr_forward(rr, w_enc, b_enc, w_cls, b_cls,
                                  use_cls_token='cls')
    jax.block_until_ready(out_cls)
    ref_cls = feats_ref[:, 0, :] @ w_cls + b_cls
    assert jnp.allclose(out_cls['unimodal_rr'], ref_cls,
                        atol=1e-4, rtol=1e-4)
    assert jnp.array_equal(out_cls['unimodal_rr'], out_cls['unified'])

    print("KERNEL_OK")
</pallas_src>

<mosaic_0001>
module attributes {stable_mosaic.version = 11 : i64} {
  func.func @_fused_linear_kernel(%arg0: i32, %arg1: memref<2x256xf32, #tpu.memory_space<vmem>>, %arg2: memref<256x128xf32, #tpu.memory_space<vmem>>, %arg3: memref<1x128xf32, #tpu.memory_space<vmem>>, %arg4: memref<2x128xf32, #tpu.memory_space<vmem>>) attributes {dimension_semantics = [#tpu.dimension_semantics<parallel>], iteration_bounds = array<i64: 1>, scalar_prefetch = 0 : i64, scratch_operands = 0 : i64, tpu.core_type = #tpu.core_type<tc>, window_params = [{transform_indices = @transform_0, window_bounds = array<i64: 2, 256>}, {pipeline_mode = #tpu.pipeline_mode<synchronous>, transform_indices = @transform_1, window_bounds = array<i64: 256, 128>}, {pipeline_mode = #tpu.pipeline_mode<synchronous>, transform_indices = @transform_2, window_bounds = array<i64: 1, 128>}, {transform_indices = @transform_3, window_bounds = array<i64: 2, 128>}]} {
    %c0 = arith.constant 0 : index
    %c0_0 = arith.constant 0 : index
    %0 = vector.load %arg1[%c0, %c0_0] : memref<2x256xf32, #tpu.memory_space<vmem>>, vector<2x256xf32>
    %c0_1 = arith.constant 0 : index
    %c0_2 = arith.constant 0 : index
    %1 = vector.load %arg2[%c0_1, %c0_2] : memref<256x128xf32, #tpu.memory_space<vmem>>, vector<256x128xf32>
    %cst = arith.constant dense<0.000000e+00> : vector<2x128xf32>
    %2 = tpu.matmul %0, %1, %cst {dimension_numbers = #tpu.dot_dimension_numbers<[1], [0], [0], [1], [0, 0, 1, 1], [], []>} : vector<2x256xf32>, vector<256x128xf32>, vector<2x128xf32> -> vector<2x128xf32>
    %c0_3 = arith.constant 0 : index
    %c0_4 = arith.constant 0 : index
    %3 = vector.load %arg3[%c0_3, %c0_4] : memref<1x128xf32, #tpu.memory_space<vmem>>, vector<1x128xf32>
    %4 = vector.broadcast %3 : vector<1x128xf32> to vector<2x128xf32>
    %5 = arith.addf %2, %4 : vector<2x128xf32>
    %c0_5 = arith.constant 0 : index
    %c0_6 = arith.constant 0 : index
    %6 = vector.load %arg4[%c0_5, %c0_6] : memref<2x128xf32, #tpu.memory_space<vmem>>, vector<2x128xf32>
    tpu.vector_store %arg4[%c0_5, %c0_6], %5 {strides = array<i32>} : memref<2x128xf32, #tpu.memory_space<vmem>>, vector<2x128xf32>,
    return
  }
  func.func @transform_0(%arg0: i32) -> (i32, i32) {
    %c0_i32 = arith.constant 0 : i32
    %c0_i32_0 = arith.constant 0 : i32
    return %arg0, %c0_i32 : i32, i32
  }
  func.func @transform_1(%arg0: i32) -> (i32, i32) {
    %c0_i32 = arith.constant 0 : i32
    %c0_i32_0 = arith.constant 0 : i32
    %c0_i32_1 = arith.constant 0 : i32
    return %c0_i32, %c0_i32_0 : i32, i32
  }
  func.func @transform_2(%arg0: i32) -> (i32, i32) {
    %c0_i32 = arith.constant 0 : i32
    %c0_i32_0 = arith.constant 0 : i32
    %c0_i32_1 = arith.constant 0 : i32
    return %c0_i32, %c0_i32_0 : i32, i32
  }
  func.func @transform_3(%arg0: i32) -> (i32, i32) {
    %c0_i32 = arith.constant 0 : i32
    %c0_i32_0 = arith.constant 0 : i32
    return %arg0, %c0_i32 : i32, i32
  }
}

</mosaic_0001>

<bundles_post_ra>
// kernel: tpu_custom_call.1
= control target key start
LH: loop header
LB: loop body
LE: loop exit
PB: predicated region body
PF: predicated region fallthrough
CT: control target
= control target key end

     0   :  { %8 = vsyncpa [#allocation3], 0  ;;  %s324_s0 = inlined_call_operand.hbm [shape: f32[2,256], index: 0, kind: input, shape index: {}]   ;;  %s325_s1 = inlined_call_operand.hbm [shape: f32[256,128], index: 1, kind: input, shape index: {}]   ;;  %s326_s2 = inlined_call_operand.vmem [shape: f32[1,128], index: 2, kind: input, shape index: {}]   ;;  %s327_s3 = inlined_call_operand.hbm [shape: f32[2,128], index: 3, kind: output, shape index: {}]  }
   0x1   :  { %9 = vsyncpa [#allocation6], 0 }
   0x2   :  { %10 = vsyncpa [#allocation4], 0  ;;  %s287_s12 = smov [#allocation2]   ;;  %s288_s14 = smov [#allocation5]  }
   0x3   :  { %s17_s13 = sshll.u32 %s287_s12, 4  ;;  %s26_s15 = sshll.u32 %s288_s14, 4  ;;  %s18_s13 = int_to_ptr.vmem [resolvable:$true] %s17_s13  ;;  %s27_s15 = int_to_ptr.vmem [resolvable:$true] %s26_s15 }
   0x4   :  { %s229_s16 = scalar_lea.vmem %s18_s13, 64  ;;  %p234_p1 = scmp.lt.s32.totalorder %s18_s13, %s18_s13 }
   0x5   :  { %p230_p0 = scmp.ne.s32.totalorder %s18_s13, %s229_s16  ;;  %p235_p2 = scmp.lt.s32.totalorder %s229_s16, %s229_s16 }
   0x7   :  { %p236_p3 = por %p235_p2, %p234_p1 }
   0x9   :  { %p237_p4 = pnand %p236_p3, %p230_p0 }
   0xb   :  { %240 = shalt.err (!%p237_p4)
}
   0xc   :  { %20 = dma.hbm_to_vmem [thread:$0]  %s324_s0, 64, %s18_s13, [#allocation3]  }
   0xd   :  { %s249_s19 = scalar_lea.vmem %s27_s15, 4096  ;;  %p254_p6 = scmp.lt.s32.totalorder %s27_s15, %s27_s15 }
   0xe   :  { %p250_p5 = scmp.ne.s32.totalorder %s27_s15, %s249_s19  ;;  %p255_p7 = scmp.lt.s32.totalorder %s249_s19, %s249_s19 }
  0x10   :  { %p256_p8 = por %p255_p7, %p254_p6 }
  0x12   :  { %p257_p9 = pnand %p256_p8, %p250_p5 }
  0x14   :  { %260 = shalt.err (!%p257_p9)
}
  0x15   :  { %s289_s20 = smov 128   ;;  %s290_s21 = smov 8  }
  0x16   :  { %32 = dma.hbm_to_vmem [thread:$0]  %s325_s1, 4096, %s27_s15, [#allocation6], %s289_s20, %s289_s20, %s290_s21  }
  0x17   :  { %281 = dma.done.wait [#allocation3], 64  }
  0x18   :  { %282 = vsyncadd [#allocation3], 4294967232 }
  0x19   :  { %283 = dma.done.wait [#allocation6], 4096  }
  0x1a   :  { %284 = vsyncadd [#allocation6], 4294963200  ;;  %v73_v0 = vld [vmem:[#allocation5 + $0xf8] sm:$0xff]  ;;  %v72_v2 = vld [vmem:[#allocation5 + $0xf0] sm:$0xff]  ;;  %s291_s24 = smov [#allocation7]  }
  0x1b   :  { %v57_v1 = vld [vmem:[#allocation5 + $0x78] sm:$0xff]  ;;  %181 = vmatprep.subr.mxu0 %v73_v0  ;;  %v56_v3 = vld [vmem:[#allocation5 + $0x70] sm:$0xff]  ;;  %v71_v4 = vld [vmem:[#allocation5 + $0xe8] sm:$0xff]  ;;  %s169_s25 = sshll.u32 %s291_s24, 4  ;;  %s170_s25 = int_to_ptr.vmem [resolvable:$true] %s169_s25 }
  0x1c   :  { %182 = vmatpush3.msra.mxu0 %v57_v1  ;;  %v55_v5 = vld [vmem:[#allocation5 + $0x68] sm:$0xff]  ;;  %v70_v6 = vld [vmem:[#allocation5 + $0xe0] sm:$0xff]  ;;  %v69_v8 = vld [vmem:[#allocation5 + $0xd8] sm:$0xff]  ;;  %s261_s26 = scalar_lea.vmem %s170_s25, 32  ;;  %p266_p11 = scmp.lt.s32.totalorder %s170_s25, %s170_s25 }
  0x1d   :  { %183 = vmatprep.subr.mxu0 %v72_v2  ;;  %v54_v7 = vld [vmem:[#allocation5 + $0x60] sm:$0xff]  ;;  %v53_v9 = vld [vmem:[#allocation5 + $0x58] sm:$0xff]  ;;  %v68_v10 = vld [vmem:[#allocation5 + $0xd0] sm:$0xff]  ;;  %p262_p10 = scmp.ne.s32.totalorder %s170_s25, %s261_s26  ;;  %p267_p12 = scmp.lt.s32.totalorder %s261_s26, %s261_s26 }
  0x1e   :  { %184 = vmatpush3.msra.mxu0 %v56_v3  ;;  %v52_v11 = vld [vmem:[#allocation5 + $0x50] sm:$0xff]  ;;  %v67_v12 = vld [vmem:[#allocation5 + $0xc8] sm:$0xff]  ;;  %v180_v13 = vld.sshfl [vmem:[#allocation2] sm:$0x33 pattern:$0x76325410] }
  0x1f   :  { %185 = vmatprep.subr.mxu0 %v71_v4  ;;  %v51_v14 = vld [vmem:[#allocation5 + $0x48] sm:$0xff]  ;;  %v89_v15 = vcombine.high %v180_v13, %v180_v13  ;;  %v66_v16 = vld [vmem:[#allocation5 + $0xc0] sm:$0xff]  ;;  %v65_v18 = vld [vmem:[#allocation5 + $0xb8] sm:$0xff]  ;;  %p268_p13 = por %p267_p12, %p266_p11 }
  0x20   :  { %186 = vmatpush3.msra.mxu0 %v55_v5  ;;  %v50_v17 = vld [vmem:[#allocation5 + $0x40] sm:$0xff]  ;;  %v49_v19 = vld [vmem:[#allocation5 + $0x38] sm:$0xff]  ;;  %v64_v20 = vld [vmem:[#allocation5 + $0xb0] sm:$0xff] }
  0x21   :  { %187 = vmatprep.subr.mxu0 %v70_v6  ;;  %156 = vmatprep.mubr.f32.mxu0 %v89_v15  ;;  %v48_v21 = vld [vmem:[#allocation5 + $0x30] sm:$0xff]  ;;  %v63_v22 = vld [vmem:[#allocation5 + $0xa8] sm:$0xff]  ;;  %v62_v24 = vld [vmem:[#allocation5 + $0xa0] sm:$0xff]  ;;  %p269_p0 = pnand %p268_p13, %p262_p10 }
  0x22   :  { %188 = vmatpush3.msra.mxu0 %v54_v7  ;;  %v47_v23 = vld [vmem:[#allocation5 + $0x28] sm:$0xff]  ;;  %v46_v25 = vld [vmem:[#allocation5 + $0x20] sm:$0xff]  ;;  %v61_v26 = vld [vmem:[#allocation5 + $0x98] sm:$0xff] }
  0x23   :  { %189 = vmatprep.subr.mxu0 %v69_v8  ;;  %v45_v27 = vld [vmem:[#allocation5 + $0x18] sm:$0xff]  ;;  %v60_v28 = vld [vmem:[#allocation5 + $0x90] sm:$0xff]  ;;  %v59_v30 = vld [vmem:[#allocation5 + $0x88] sm:$0xff] }
  0x24   :  { %190 = vmatpush3.msra.mxu0 %v53_v9  ;;  %v44_v29 = vld [vmem:[#allocation5 + $0x10] sm:$0xff]  ;;  %v43_v31 = vld [vmem:[#allocation5 + $0x8] sm:$0xff]  ;;  %v58_v32 = vld [vmem:[#allocation5 + $0x80] sm:$0xff] }
  0x25   :  { %191 = vmatprep.subr.mxu0 %v68_v10  ;;  %v42_v33 = vld [vmem:[#allocation5] sm:$0xff]  ;;  %v179_v35 = vld [vmem:[%s326_s2] ss:$0 sm:$0xff] }
  0x26   :  { %192 = vmatpush3.msra.mxu0 %v52_v11 }
  0x27   :  { %193 = vmatprep.subr.mxu0 %v67_v12 }
  0x28   :  { %194 = vmatpush3.msra.mxu0 %v51_v14 }
  0x29   :  { %195 = vmatprep.subr.mxu0 %v66_v16 }
  0x2a   :  { %196 = vmatpush3.msra.mxu0 %v50_v17 }
  0x2b   :  { %197 = vmatprep.subr.mxu0 %v65_v18 }
  0x2c   :  { %198 = vmatpush3.msra.mxu0 %v49_v19 }
  0x2d   :  { %199 = vmatprep.subr.mxu0 %v64_v20 }
  0x2e   :  { %200 = vmatpush3.msra.mxu0 %v48_v21 }
  0x2f   :  { %201 = vmatprep.subr.mxu0 %v63_v22 }
  0x30   :  { %202 = vmatpush3.msra.mxu0 %v47_v23 }
  0x31   :  { %203 = vmatprep.subr.mxu0 %v62_v24 }
  0x32   :  { %204 = vmatpush3.msra.mxu0 %v46_v25 }
  0x33   :  { %205 = vmatprep.subr.mxu0 %v61_v26 }
  0x34   :  { %206 = vmatpush3.msra.mxu0 %v45_v27 }
  0x35   :  { %207 = vmatprep.subr.mxu0 %v60_v28 }
  0x36   :  { %208 = vmatpush3.msra.mxu0 %v44_v29 }
  0x37   :  { %209 = vmatprep.subr.mxu0 %v59_v30 }
  0x38   :  { %210 = vmatpush3.msra.mxu0 %v43_v31 }
  0x39   :  { %211 = vmatprep.subr.mxu0 %v58_v32 }
  0x3a   :  { %212 = vmatpush3.msra.mxu0 %v42_v33 }
  0x3b   :  { %157 = vmatmul.mubr.f32.vlgmr.msra.gmra.mxu0 %v180_v13 }
  0xfb   :  { %v213_v34 = vpop.f32.mrf.mxu0 }
  0xfd   :  { %v214_v36 = vpop.f32.mrf.mxu0 }
  0xfe   :  { %v215_v37 = vadd.f32 %v214_v36, %v213_v34 }
 0x100   :  { %v159_v38 = vadd.f32 %v215_v37, %v179_v35 }
 0x102   :  { %162 = vst [vmem:[#allocation7] sm:$0x3] %v159_v38 }
 0x103   :  { %272 = shalt.err (!%p269_p0)
}
 0x104   :  { %172 = dma.vmem_to_hbm [thread:$0]  %s170_s25, 32, %s327_s3, [#allocation4]  }
 0x105   :  { %285 = dma.done.wait [#allocation4], 32  }
 0x106   :  { %286 = vsyncadd [#allocation4], 4294967264 }
 0x107   :  { %176 = vsyncpa [#allocation3], 1 }
 0x108   :  { %177 = vsyncpa [#allocation6], 1 }
 0x109   :  { %178 = vsyncpa [#allocation4], 1 }

</bundles_post_ra>
